<compile_context>
chip_gen: v6e
topology: v6e:2x2x1
jax: 0.10.0
libtpu: 0.0.40
codegen_flags: <defaults>
</compile_context>

<pallas_src>
import functools

import jax
import jax.numpy as jnp
from jax.experimental import pallas as pl
from jax.experimental.pallas import tpu as pltpu


_VMEM_BUDGET_BYTES = 12 * 1024 * 1024  # safe vs. 16/32/32 MiB scoped defaults


def _round_up(x, m):
    return ((x + m - 1) // m) * m


def _sublane_unit(dtype):
    # min sublane tile: 8 rows for 32-bit, 16 for bf16, 32 for int8/fp8
    return 8 * (4 // jnp.dtype(dtype).itemsize)


def _pick_tile(padded, unit, max_tile):
    """Largest multiple of `unit` that divides `padded` and is <= max_tile."""
    best = unit
    t = unit
    while t <= max_tile:
        if padded % t == 0:
            best = t
        t += unit
    return best


def _footprint_bytes(tm, tn, tk, itemsize, split_k):
    # double-buffered x, w, bias, out tiles (+ f32 accumulator if split-K)
    b = 2 * itemsize * (tm * tk + tk * tn + tn + tm * tn)
    if split_k:
        b += 4 * tm * tn
    return b


# ---------------------------------------------------------------------------
# Kernels
# ---------------------------------------------------------------------------

def _linear_kernel_fullk(x_ref, w_ref, b_ref, o_ref):
    # x_ref: [tm, K]   w_ref: [K, tn]   b_ref: [1, tn]   o_ref: [tm, tn]
    o_ref[...] = (
        jnp.dot(x_ref[...], w_ref[...], preferred_element_type=jnp.float32)
        + b_ref[...]
    ).astype(o_ref.dtype)


def _linear_kernel_splitk(x_ref, w_ref, b_ref, o_ref, acc_ref):
    k = pl.program_id(2)
    part = jnp.dot(x_ref[...], w_ref[...], preferred_element_type=jnp.float32)

    @pl.when(k == 0)
    def _first():  # write, don't zero-init + add
        acc_ref[...] = part

    @pl.when(k != 0)
    def _accum():
        acc_ref[...] += part

    @pl.when(k == pl.num_programs(2) - 1)
    def _finalize():
        o_ref[...] = (acc_ref[...] + b_ref[...]).astype(o_ref.dtype)


# ---------------------------------------------------------------------------
# Parameter preparation (adaptation-time, NOT per forward call)
# ---------------------------------------------------------------------------

def prepare_classifier_params(weight, bias):
    """Pad + transpose once.

    weight: [out_features, in_features]  (PyTorch Linear layout)
    bias:   [out_features]
    returns (w_t [in_pad, out_pad], bias_row [1, out_pad], out_features)
    """
    out_features, in_features = weight.shape
    in_pad = _round_up(in_features, 128)
    out_pad = _round_up(out_features, 128)
    w_p = weight
    if (out_pad, in_pad) != (out_features, in_features):
        w_p = jnp.pad(weight, ((0, out_pad - out_features),
                               (0, in_pad - in_features)))
    w_t = jnp.transpose(w_p)  # [in_pad, out_pad] -> standard ((1,),(0,)) contraction
    b_row = jnp.pad(bias, (0, out_pad - out_features)).reshape(1, out_pad)
    return w_t, b_row, out_features


# ---------------------------------------------------------------------------
# Forward
# ---------------------------------------------------------------------------

@functools.partial(jax.jit, static_argnames=("out_features",))
def incremental_classifier_forward_prepared(x, w_t, b_row, *, out_features):
    """Forward with parameters already prepared by prepare_classifier_params.

    x:     [batch, in_features]
    w_t:   [in_pad, out_pad]   (padded, transposed weight)
    b_row: [1, out_pad]        (padded bias row)
    returns [batch, out_features]
    """
    batch, in_features = x.shape
    in_pad, out_pad = w_t.shape

    sub = _sublane_unit(x.dtype)
    b_pad = _round_up(batch, sub)

    # Pad x only to the hardware minimum (sublane unit x 128 lanes).
    x_p = x
    if (b_pad, in_pad) != (batch, in_features):
        x_p = jnp.pad(x, ((0, b_pad - batch), (0, in_pad - in_features)))

    itemsize = jnp.dtype(x.dtype).itemsize

    # Tiles: divisors of the hw-padded sizes (no tile-multiple padding waste).
    tm = _pick_tile(b_pad, sub, 512)
    tn = _pick_tile(out_pad, 128, 512)

    # Collapse K if the full padded in_features fits the VMEM budget.
    if _footprint_bytes(tm, tn, in_pad, itemsize, split_k=False) <= _VMEM_BUDGET_BYTES:
        split_k = False
        tk = in_pad
    else:
        split_k = True
        tk = 128
        cand = 128
        while cand <= in_pad:
            if in_pad % cand == 0 and _footprint_bytes(
                    tm, tn, cand, itemsize, split_k=True) <= _VMEM_BUDGET_BYTES:
                tk = cand
            cand += 128

    # v7x has 2 TensorCores: make sure there are >=2 blocks on a parallel axis
    # when the padded problem allows it (no-op on v5e/v6e).
    if (b_pad // tm) * (out_pad // tn) == 1:
        if out_pad // 128 >= 2:
            tn = _pick_tile(out_pad, 128, out_pad // 2)
        elif b_pad // sub >= 2:
            tm = _pick_tile(b_pad, sub, b_pad // 2)

    cost = pl.CostEstimate(
        flops=2 * batch * in_features * out_features,
        transcendentals=0,
        bytes_accessed=(x.size * itemsize
                        + w_t.size * jnp.dtype(w_t.dtype).itemsize
                        + b_row.size * jnp.dtype(b_row.dtype).itemsize
                        + batch * out_features * itemsize),
    )

    if not split_k:
        grid = (b_pad // tm, out_pad // tn)
        out_p = pl.pallas_call(
            _linear_kernel_fullk,
            out_shape=jax.ShapeDtypeStruct((b_pad, out_pad), x.dtype),
            grid_spec=pltpu.PrefetchScalarGridSpec(
                num_scalar_prefetch=0,
                grid=grid,
                in_specs=[
                    pl.BlockSpec((tm, in_pad), lambda i, j: (i, 0)),  # x
                    pl.BlockSpec((in_pad, tn), lambda i, j: (0, j)),  # W.T
                    pl.BlockSpec((1, tn), lambda i, j: (0, j)),       # bias
                ],
                out_specs=pl.BlockSpec((tm, tn), lambda i, j: (i, j)),
            ),
            compiler_params=pltpu.CompilerParams(
                dimension_semantics=("parallel", "parallel")),
            cost_estimate=cost,
        )(x_p, w_t, b_row)
    else:
        grid = (b_pad // tm, out_pad // tn, in_pad // tk)
        out_p = pl.pallas_call(
            _linear_kernel_splitk,
            out_shape=jax.ShapeDtypeStruct((b_pad, out_pad), x.dtype),
            grid_spec=pltpu.PrefetchScalarGridSpec(
                num_scalar_prefetch=0,
                grid=grid,
                in_specs=[
                    pl.BlockSpec((tm, tk), lambda i, j, k: (i, k)),   # x
                    pl.BlockSpec((tk, tn), lambda i, j, k: (k, j)),   # W.T
                    pl.BlockSpec((1, tn), lambda i, j, k: (0, j)),    # bias
                ],
                out_specs=pl.BlockSpec((tm, tn), lambda i, j, k: (i, j)),
                scratch_shapes=[pltpu.VMEM((tm, tn), jnp.float32)],
            ),
            compiler_params=pltpu.CompilerParams(
                dimension_semantics=("parallel", "parallel", "arbitrary")),
            cost_estimate=cost,
        )(x_p, w_t, b_row)

    # Slice only if padding was actually introduced (avoid an extra HBM pass
    # when batch / out_features are already aligned).
    if (b_pad, out_pad) == (batch, out_features):
        return out_p
    return out_p[:batch, :out_features]


def incremental_classifier_forward(x, weight, bias):
    """Convenience wrapper taking raw PyTorch-layout parameters.

    For repeated forwards, call prepare_classifier_params once (e.g. inside
    adaptation()) and use incremental_classifier_forward_prepared instead.
    """
    w_t, b_row, out_features = prepare_classifier_params(weight, bias)
    return incremental_classifier_forward_prepared(
        x, w_t, b_row, out_features=out_features)


# TODO(synk): adaptation() (growing out_features / copying old rows) is host-side
# parameter surgery with no kernel equivalent; re-run prepare_classifier_params
# on the grown weight/bias after adaptation.


if __name__ == "__main__":
    # Module config: in_features=32, initial_out_features=2
    in_features = 32
    out_features = 2
    batch = 8

    key = jax.random.PRNGKey(0)
    kx, kw, kb = jax.random.split(key, 3)

    # Deterministic init mimicking nn.Linear default uniform(-1/sqrt(in), 1/sqrt(in)).
    bound = 1.0 / (in_features ** 0.5)
    weight = jax.random.uniform(kw, (out_features, in_features),
                                dtype=jnp.float32, minval=-bound, maxval=bound)
    bias = jax.random.uniform(kb, (out_features,),
                              dtype=jnp.float32, minval=-bound, maxval=bound)
    x = jax.random.normal(kx, (batch, in_features), dtype=jnp.float32)

    # Adaptation-time prep (once), then forward.
    w_t, b_row, n_out = prepare_classifier_params(weight, bias)
    out = incremental_classifier_forward_prepared(x, w_t, b_row, out_features=n_out)
    out = jax.block_until_ready(out)

    # Pure-JAX reference check
    ref = x @ weight.T + bias
    assert out.shape == (batch, out_features)
    assert jnp.allclose(out, ref, atol=1e-5, rtol=1e-5), "mismatch vs reference"

    print("KERNEL_OK")
</pallas_src>

<mosaic_0001>
module attributes {stable_mosaic.version = 11 : i64} {
  func.func @_linear_kernel_fullk(%arg0: i32, %arg1: i32, %arg2: memref<8x128xf32, #tpu.memory_space<vmem>>, %arg3: memref<128x128xf32, #tpu.memory_space<vmem>>, %arg4: memref<1x128xf32, #tpu.memory_space<vmem>>, %arg5: memref<8x128xf32, #tpu.memory_space<vmem>>) attributes {dimension_semantics = [#tpu.dimension_semantics<parallel>, #tpu.dimension_semantics<parallel>], iteration_bounds = array<i64: 1, 1>, scalar_prefetch = 0 : i64, scratch_operands = 0 : i64, tpu.core_type = #tpu.core_type<tc>, window_params = [{transform_indices = @transform_0, window_bounds = array<i64: 8, 128>}, {transform_indices = @transform_1, window_bounds = array<i64: 128, 128>}, {transform_indices = @transform_2, window_bounds = array<i64: 1, 128>}, {transform_indices = @transform_3, window_bounds = array<i64: 8, 128>}]} {
    %c0 = arith.constant 0 : index
    %c0_0 = arith.constant 0 : index
    %0 = vector.load %arg2[%c0, %c0_0] : memref<8x128xf32, #tpu.memory_space<vmem>>, vector<8x128xf32>
    %c0_1 = arith.constant 0 : index
    %c0_2 = arith.constant 0 : index
    %1 = vector.load %arg3[%c0_1, %c0_2] : memref<128x128xf32, #tpu.memory_space<vmem>>, vector<128x128xf32>
    %cst = arith.constant dense<0.000000e+00> : vector<8x128xf32>
    %2 = tpu.matmul %0, %1, %cst {dimension_numbers = #tpu.dot_dimension_numbers<[1], [0], [0], [1], [0, 0, 1, 1], [], []>} : vector<8x128xf32>, vector<128x128xf32>, vector<8x128xf32> -> vector<8x128xf32>
    %c0_3 = arith.constant 0 : index
    %c0_4 = arith.constant 0 : index
    %3 = vector.load %arg4[%c0_3, %c0_4] : memref<1x128xf32, #tpu.memory_space<vmem>>, vector<1x128xf32>
    %4 = vector.broadcast %3 : vector<1x128xf32> to vector<8x128xf32>
    %5 = arith.addf %2, %4 : vector<8x128xf32>
    %c0_5 = arith.constant 0 : index
    %c0_6 = arith.constant 0 : index
    %6 = vector.load %arg5[%c0_5, %c0_6] : memref<8x128xf32, #tpu.memory_space<vmem>>, vector<8x128xf32>
    tpu.vector_store %arg5[%c0_5, %c0_6], %5 {strides = array<i32>} : memref<8x128xf32, #tpu.memory_space<vmem>>, vector<8x128xf32>,
    return
  }
  func.func @transform_0(%arg0: i32, %arg1: i32) -> (i32, i32) {
    %c0_i32 = arith.constant 0 : i32
    %c0_i32_0 = arith.constant 0 : i32
    return %arg0, %c0_i32 : i32, i32
  }
  func.func @transform_1(%arg0: i32, %arg1: i32) -> (i32, i32) {
    %c0_i32 = arith.constant 0 : i32
    %c0_i32_0 = arith.constant 0 : i32
    return %c0_i32, %arg1 : i32, i32
  }
  func.func @transform_2(%arg0: i32, %arg1: i32) -> (i32, i32) {
    %c0_i32 = arith.constant 0 : i32
    %c0_i32_0 = arith.constant 0 : i32
    return %c0_i32, %arg1 : i32, i32
  }
  func.func @transform_3(%arg0: i32, %arg1: i32) -> (i32, i32) {
    %c0_i32 = arith.constant 0 : i32
    return %arg0, %arg1 : i32, i32
  }
}

</mosaic_0001>

<bundles_post_ra>
// kernel: incremental_classifier_forward_prepared.1
= control target key start
LH: loop header
LB: loop body
LE: loop exit
PB: predicated region body
PF: predicated region fallthrough
CT: control target
= control target key end

     0   :  { %8 = vsyncpa [#allocation3], 0  ;;  %s208_s12 = smov [#allocation2]   ;;  %s245_s0 = inlined_call_operand.vmem [shape: f32[8,128], index: 0, kind: input, shape index: {}]   ;;  %s246_s1 = inlined_call_operand.hbm [shape: f32[128,128], index: 1, kind: input, shape index: {}]   ;;  %s247_s2 = inlined_call_operand.vmem [shape: f32[1,128], index: 2, kind: input, shape index: {}]   ;;  %s248_s3 = inlined_call_operand.vmem [shape: f32[8,128], index: 3, kind: output, shape index: {}]  }
   0x1   :  { %s16_s13 = sshll.u32 %s208_s12, 4  ;;  %s17_s13 = int_to_ptr.vmem [resolvable:$true] %s16_s13 }
   0x2   :  { %s194_s14 = scalar_lea.vmem %s17_s13, 2048  ;;  %p199_p1 = scmp.lt.s32.totalorder %s17_s13, %s17_s13 }
   0x3   :  { %p195_p0 = scmp.ne.s32.totalorder %s17_s13, %s194_s14  ;;  %p200_p2 = scmp.lt.s32.totalorder %s194_s14, %s194_s14 }
   0x5   :  { %p201_p3 = por %p200_p2, %p199_p1 }
   0x7   :  { %p202_p4 = pnand %p201_p3, %p195_p0 }
   0x9   :  { %205 = shalt.err (!%p202_p4)
}
   0xa   :  { %s209_s15 = smov 128   ;;  %s210_s16 = smov 8  }
   0xb   :  { %22 = dma.hbm_to_vmem [thread:$0]  %s246_s1, 2048, %s17_s13, [#allocation3], %s209_s15, %s209_s15, %s210_s16  }
   0xc   :  { %206 = dma.done.wait [#allocation3], 2048  }
   0xd   :  { %207 = vsyncadd [#allocation3], 4294965248  ;;  %v211_v0 = vmov 0.0   ;;  %vm212_vm0 = vmmov 0   ;;  %v44_v1 = vld [vmem:[#allocation2 + $0x78] sm:$0xff]  ;;  %v43_v2 = vld [vmem:[#allocation2 + $0x70] sm:$0xff] }
   0xe   :  { %146 = vmatprep.subr.mxu0 %v211_v0  ;;  %178 = vmatprep.mubr.msk.f32.mxu0 %vm212_vm0, %v211_v0  ;;  %v42_v3 = vld [vmem:[#allocation2 + $0x68] sm:$0xff]  ;;  %v41_v4 = vld [vmem:[#allocation2 + $0x60] sm:$0xff]  ;;  %v40_v5 = vld [vmem:[#allocation2 + $0x58] sm:$0xff] }
   0xf   :  { %147 = vmatpush3.msra.mxu0 %v44_v1  ;;  %v39_v6 = vld [vmem:[#allocation2 + $0x50] sm:$0xff]  ;;  %v38_v7 = vld [vmem:[#allocation2 + $0x48] sm:$0xff]  ;;  %v37_v8 = vld [vmem:[#allocation2 + $0x40] sm:$0xff] }
  0x10   :  { %148 = vmatprep.subr.mxu0 %v211_v0  ;;  %v36_v9 = vld [vmem:[#allocation2 + $0x38] sm:$0xff]  ;;  %v35_v10 = vld [vmem:[#allocation2 + $0x30] sm:$0xff]  ;;  %v34_v11 = vld [vmem:[#allocation2 + $0x28] sm:$0xff] }
  0x11   :  { %149 = vmatpush3.msra.mxu0 %v43_v2  ;;  %v33_v12 = vld [vmem:[#allocation2 + $0x20] sm:$0xff]  ;;  %v32_v13 = vld [vmem:[#allocation2 + $0x18] sm:$0xff]  ;;  %v31_v14 = vld [vmem:[#allocation2 + $0x10] sm:$0xff] }
  0x12   :  { %150 = vmatprep.subr.mxu0 %v211_v0  ;;  %v30_v15 = vld [vmem:[#allocation2 + $0x8] sm:$0xff]  ;;  %v29_v16 = vld [vmem:[#allocation2] sm:$0xff] }
  0x13   :  { %151 = vmatpush3.msra.mxu0 %v42_v3  ;;  %v28_v17 = vld [vmem:[%s245_s0] sm:$0xff] }
  0x14   :  { %152 = vmatprep.subr.mxu0 %v211_v0  ;;  %v128_v18 = vld [vmem:[%s247_s2] ss:$0 sm:$0xff] }
  0x15   :  { %153 = vmatpush3.msra.mxu0 %v41_v4 }
  0x16   :  { %154 = vmatprep.subr.mxu0 %v211_v0 }
  0x17   :  { %155 = vmatpush3.msra.mxu0 %v40_v5 }
  0x18   :  { %156 = vmatprep.subr.mxu0 %v211_v0 }
  0x19   :  { %157 = vmatpush3.msra.mxu0 %v39_v6 }
  0x1a   :  { %158 = vmatprep.subr.mxu0 %v211_v0 }
  0x1b   :  { %159 = vmatpush3.msra.mxu0 %v38_v7 }
  0x1c   :  { %160 = vmatprep.subr.mxu0 %v211_v0 }
  0x1d   :  { %161 = vmatpush3.msra.mxu0 %v37_v8 }
  0x1e   :  { %162 = vmatprep.subr.mxu0 %v211_v0 }
  0x1f   :  { %163 = vmatpush3.msra.mxu0 %v36_v9 }
  0x20   :  { %164 = vmatprep.subr.mxu0 %v211_v0 }
  0x21   :  { %165 = vmatpush3.msra.mxu0 %v35_v10 }
  0x22   :  { %166 = vmatprep.subr.mxu0 %v211_v0 }
  0x23   :  { %167 = vmatpush3.msra.mxu0 %v34_v11 }
  0x24   :  { %168 = vmatprep.subr.mxu0 %v211_v0 }
  0x25   :  { %169 = vmatpush3.msra.mxu0 %v33_v12 }
  0x26   :  { %170 = vmatprep.subr.mxu0 %v211_v0 }
  0x27   :  { %171 = vmatpush3.msra.mxu0 %v32_v13 }
  0x28   :  { %172 = vmatprep.subr.mxu0 %v211_v0 }
  0x29   :  { %173 = vmatpush3.msra.mxu0 %v31_v14 }
  0x2a   :  { %174 = vmatprep.subr.mxu0 %v211_v0 }
  0x2b   :  { %175 = vmatpush3.msra.mxu0 %v30_v15 }
  0x2c   :  { %176 = vmatprep.subr.mxu0 %v211_v0 }
  0x2d   :  { %177 = vmatpush3.msra.mxu0 %v29_v16 }
  0x2e   :  { %179 = vmatmul.mubr.f32.vlgmr.msra.gmra.mxu0 %v28_v17 }
  0xee   :  { %v118_v19 = vpop.f32.mrf.mxu0 }
  0xef   :  { %v119_v20 = vadd.f32 %v128_v18, %v118_v19 }
  0xf0   :  { %v180_v21 = vpop.f32.mrf.mxu0 }
  0xf1   :  { %122 = vst [vmem:[%s248_s3] sm:$0xff] %v119_v20 }
  0xf2   :  { %127 = vsyncpa [#allocation3], 1 }

</bundles_post_ra>
